<compile_context>
chip_gen: v7x
topology: tpu7x:2x2x1
jax: 0.10.0
libtpu: 0.0.40
codegen_flags: <defaults>
</compile_context>

<pallas_src>
import math
from functools import partial

import jax
import jax.numpy as jnp
from jax import lax
from jax.experimental import pallas as pl
from jax.experimental.pallas import tpu as pltpu

_VMEM_LIMIT = 32 * 1024 * 1024


# -----------------------------------------------------------------------------
# tile-size helpers
# -----------------------------------------------------------------------------
def _pick_tile(dim, target, align):
    """Largest multiple of `align` <= target dividing dim, else full dim."""
    if dim <= target:
        return dim
    t = (target // align) * align
    while t >= align:
        if dim % t == 0:
            return t
        t -= align
    return dim


def _pick_row_tile(dim, target=256):
    if dim <= target:
        return dim
    for align in (128, 8):
        t = (target // align) * align
        while t >= align:
            if dim % t == 0:
                return t
            t -= align
    return dim


# -----------------------------------------------------------------------------
# fused (LayerNorm?) + matmul + bias, tiled over M / N / K with f32 accumulator
# -----------------------------------------------------------------------------
def _matmul_kernel(x_ref, w_ref, b_ref, o_ref, acc_ref, *, apply_ln):
    kk = pl.program_id(2)

    @pl.when(kk == 0)
    def _():
        acc_ref[...] = jnp.zeros_like(acc_ref)

    xv = x_ref[...]
    if apply_ln:
        xf = xv.astype(jnp.float32)
        mu = jnp.mean(xf, axis=-1, keepdims=True)
        var = jnp.mean((xf - mu) * (xf - mu), axis=-1, keepdims=True)
        xv = ((xf - mu) * lax.rsqrt(var + 1e-5)).astype(jnp.bfloat16)

    acc_ref[...] += jnp.dot(xv, w_ref[...], preferred_element_type=jnp.float32)

    @pl.when(kk == pl.num_programs(2) - 1)
    def _():
        o_ref[...] = (acc_ref[...] + b_ref[...]).astype(o_ref.dtype)


def pallas_matmul(x, w, bias=None, apply_ln=False, out_dtype=jnp.bfloat16):
    """(M,K)@(K,N)+bias, optionally LayerNorm-ing x rows first (needs full K rows)."""
    M, K = x.shape
    K2, N = w.shape
    assert K == K2
    if bias is None:
        bias = jnp.zeros((N,), jnp.float32)
    bias2d = bias.reshape(1, N).astype(jnp.float32)

    bm = _pick_row_tile(M, 256)
    bn = _pick_tile(N, 256, 128)
    bk = K if apply_ln else _pick_tile(K, 512, 128)
    grid = (M // bm, N // bn, K // bk)

    return pl.pallas_call(
        partial(_matmul_kernel, apply_ln=apply_ln),
        out_shape=jax.ShapeDtypeStruct((M, N), out_dtype),
        grid=grid,
        in_specs=[
            pl.BlockSpec((bm, bk), lambda i, j, kk: (i, kk)),
            pl.BlockSpec((bk, bn), lambda i, j, kk: (kk, j)),
            pl.BlockSpec((1, bn), lambda i, j, kk: (0, j)),
        ],
        out_specs=pl.BlockSpec((bm, bn), lambda i, j, kk: (i, j)),
        scratch_shapes=[pltpu.VMEM((bm, bn), jnp.float32)],
        compiler_params=pltpu.CompilerParams(
            dimension_semantics=("parallel", "parallel", "arbitrary"),
            vmem_limit_bytes=_VMEM_LIMIT,
        ),
    )(x.astype(jnp.bfloat16), w.astype(jnp.bfloat16), bias2d)


# -----------------------------------------------------------------------------
# fused LayerNorm + MLP (w1 -> gelu -> w2), tiled over the hidden (4D) dim
# -----------------------------------------------------------------------------
def _mlp_kernel(x_ref, w1_ref, w2_ref, o_ref, xn_ref, acc_ref):
    hh = pl.program_id(1)

    @pl.when(hh == 0)
    def _():
        xf = x_ref[...].astype(jnp.float32)
        mu = jnp.mean(xf, axis=-1, keepdims=True)
        var = jnp.mean((xf - mu) * (xf - mu), axis=-1, keepdims=True)
        xn_ref[...] = ((xf - mu) * lax.rsqrt(var + 1e-5)).astype(jnp.bfloat16)
        acc_ref[...] = jnp.zeros_like(acc_ref)

    h = jnp.dot(xn_ref[...], w1_ref[...], preferred_element_type=jnp.float32)
    # TODO(synk): tanh-approx GELU; Decoder source not provided (exact erf GELU differs slightly)
    h = jax.nn.gelu(h)
    acc_ref[...] += jnp.dot(h.astype(jnp.bfloat16), w2_ref[...],
                            preferred_element_type=jnp.float32)

    @pl.when(hh == pl.num_programs(1) - 1)
    def _():
        o_ref[...] = acc_ref[...].astype(o_ref.dtype)


def pallas_ln_mlp(x, w1, w2):
    M, D = x.shape
    H = w1.shape[1]
    bm = _pick_row_tile(M, 256)
    bh = _pick_tile(H, 256, 128)
    grid = (M // bm, H // bh)
    return pl.pallas_call(
        _mlp_kernel,
        out_shape=jax.ShapeDtypeStruct((M, D), jnp.bfloat16),
        grid=grid,
        in_specs=[
            pl.BlockSpec((bm, D), lambda i, hh: (i, 0)),
            pl.BlockSpec((D, bh), lambda i, hh: (0, hh)),
            pl.BlockSpec((bh, D), lambda i, hh: (hh, 0)),
        ],
        out_specs=pl.BlockSpec((bm, D), lambda i, hh: (i, 0)),
        scratch_shapes=[
            pltpu.VMEM((bm, D), jnp.bfloat16),   # cached LN(x)
            pltpu.VMEM((bm, D), jnp.float32),    # accumulator
        ],
        compiler_params=pltpu.CompilerParams(
            dimension_semantics=("parallel", "arbitrary"),
            vmem_limit_bytes=_VMEM_LIMIT,
        ),
    )(x.astype(jnp.bfloat16), w1.astype(jnp.bfloat16), w2.astype(jnp.bfloat16))


# -----------------------------------------------------------------------------
# flash-style causal multi-head attention: grid (B, q_tiles, kv_tiles),
# heads looped inside the kernel, lane-dense (full-D) output per batch.
# -----------------------------------------------------------------------------
def _flash_attn_kernel(q_ref, k_ref, v_ref, o_ref, m_sc, l_sc, acc_sc, *, nheads, scale):
    _, tq, D = q_ref.shape
    tk = k_ref.shape[1]
    Dh = D // nheads
    qi = pl.program_id(1)
    ki = pl.program_id(2)

    @pl.when(ki == 0)
    def _():
        m_sc[...] = jnp.full(m_sc.shape, -1e30, jnp.float32)
        l_sc[...] = jnp.zeros_like(l_sc)
        acc_sc[...] = jnp.zeros_like(acc_sc)

    q_start = qi * tq
    k_start = ki * tk

    # skip kv tiles strictly above the causal diagonal
    @pl.when(k_start <= q_start + tq - 1)
    def _():
        q = q_ref[0]            # (tq, D) bf16
        k = k_ref[0]            # (tk, D) bf16
        v = v_ref[0]            # (tk, D) bf16
        row = lax.broadcasted_iota(jnp.int32, (tq, tk), 0) + q_start
        col = lax.broadcasted_iota(jnp.int32, (tq, tk), 1) + k_start
        causal = col <= row
        for h in range(nheads):
            sl = slice(h * Dh, (h + 1) * Dh)
            s = lax.dot_general(q[:, sl], k[:, sl], (((1,), (1,)), ((), ())),
                                preferred_element_type=jnp.float32) * scale
            s = jnp.where(causal, s, -1e30)
            m_prev = m_sc[h]                                       # (tq, 1)
            m_new = jnp.maximum(m_prev, jnp.max(s, axis=-1, keepdims=True))
            alpha = jnp.exp(m_prev - m_new)
            p = jnp.exp(s - m_new)                                 # (tq, tk)
            l_sc[h] = alpha * l_sc[h] + jnp.sum(p, axis=-1, keepdims=True)
            acc_sc[h] = alpha * acc_sc[h] + jnp.dot(
                p.astype(v.dtype), v[:, sl], preferred_element_type=jnp.float32)
            m_sc[h] = m_new

    @pl.when(ki == pl.num_programs(2) - 1)
    def _():
        outs = []
        for h in range(nheads):
            inv_l = pl.reciprocal(l_sc[h], approx=True)            # EUP slot
            outs.append(acc_sc[h] * inv_l)                         # (tq, Dh)
        o_ref[0] = jnp.concatenate(outs, axis=-1).astype(o_ref.dtype)   # lane-dense store


def pallas_flash_attention(q, k, v, nheads):
    """q, k, v: (B, S, D) bf16, heads packed contiguously along D."""
    B, S, D = q.shape
    Dh = D // nheads
    tq = min(S, 128)
    tk = min(S, 128)
    assert S % tq == 0 and S % tk == 0
    grid = (B, S // tq, S // tk)
    kern = partial(_flash_attn_kernel, nheads=nheads, scale=1.0 / math.sqrt(Dh))
    q_spec = pl.BlockSpec((1, tq, D), lambda b, i, j: (b, i, 0))
    kv_spec = pl.BlockSpec((1, tk, D), lambda b, i, j: (b, j, 0))
    return pl.pallas_call(
        kern,
        out_shape=jax.ShapeDtypeStruct((B, S, D), jnp.bfloat16),
        grid=grid,
        in_specs=[q_spec, kv_spec, kv_spec],
        out_specs=pl.BlockSpec((1, tq, D), lambda b, i, j: (b, i, 0)),
        scratch_shapes=[
            pltpu.VMEM((nheads, tq, 1), jnp.float32),    # running max
            pltpu.VMEM((nheads, tq, 1), jnp.float32),    # running denom
            pltpu.VMEM((nheads, tq, Dh), jnp.float32),   # running numerator
        ],
        compiler_params=pltpu.CompilerParams(
            dimension_semantics=("parallel", "parallel", "arbitrary"),
            vmem_limit_bytes=_VMEM_LIMIT,
        ),
    )(q.astype(jnp.bfloat16), k.astype(jnp.bfloat16), v.astype(jnp.bfloat16))


# -----------------------------------------------------------------------------
# token-level cross-entropy (ignore_index = pad_idx = 0), tiled over rows
# -----------------------------------------------------------------------------
def _ce_kernel(logits_ref, labels_ref, loss_ref, cnt_ref):
    logits = logits_ref[...].astype(jnp.float32)       # (bm, C)
    labels = labels_ref[...]                           # (bm, 1) int32
    m = jnp.max(logits, axis=-1, keepdims=True)
    lse = jnp.log(jnp.sum(jnp.exp(logits - m), axis=-1, keepdims=True)) + m
    cls = lax.broadcasted_iota(jnp.int32, logits.shape, 1)
    onehot = (cls == labels).astype(jnp.float32)
    logp = jnp.sum((logits - lse) * onehot, axis=-1, keepdims=True)
    valid = (labels != 0).astype(jnp.float32)          # ignore_index = pad_idx = 0
    loss_ref[...] = -logp * valid
    cnt_ref[...] = valid


def pallas_cross_entropy(logits, labels):
    """logits (M, C) f32, labels (M,) int32; mean over labels != 0."""
    M, C = logits.shape
    labels2d = labels.reshape(M, 1).astype(jnp.int32)
    bm = _pick_row_tile(M, 256)
    grid = (M // bm,)
    loss, cnt = pl.pallas_call(
        _ce_kernel,
        out_shape=(
            jax.ShapeDtypeStruct((M, 1), jnp.float32),
            jax.ShapeDtypeStruct((M, 1), jnp.float32),
        ),
        grid=grid,
        in_specs=[
            pl.BlockSpec((bm, C), lambda i: (i, 0)),
            pl.BlockSpec((bm, 1), lambda i: (i, 0)),
        ],
        out_specs=(
            pl.BlockSpec((bm, 1), lambda i: (i, 0)),
            pl.BlockSpec((bm, 1), lambda i: (i, 0)),
        ),
        compiler_params=pltpu.CompilerParams(dimension_semantics=("parallel",)),
    )(logits, labels2d)
    return jnp.sum(loss) / jnp.maximum(jnp.sum(cnt), 1.0)


# -----------------------------------------------------------------------------
# Model glue (plain JAX)
# -----------------------------------------------------------------------------
def scaled_sinusoidal(pos, dim, scale, theta=10000.0):
    half = dim // 2
    inv_freq = theta ** -(jnp.arange(half, dtype=jnp.float32) / half)
    ang = pos.astype(jnp.float32)[:, None] * inv_freq[None, :]
    return jnp.concatenate([jnp.sin(ang), jnp.cos(ang)], axis=-1) * scale


def decoder_forward(params, x, nheads):
    """Pre-LN causal GPT decoder (bias=False, dropout=0.0). x: (B, S, D) bf16.
    NOTE: the final LayerNorm is fused into the text_head matmul by the caller."""
    B, S, D = x.shape
    xf = x.reshape(B * S, D)
    for lp in params["layers"]:
        # --- attention block: fused LN + QKV projection ---
        qkv = pallas_matmul(xf, lp["wqkv"], apply_ln=True)            # (M, 3D) bf16
        q = qkv[:, :D].reshape(B, S, D)
        k = qkv[:, D:2 * D].reshape(B, S, D)
        v = qkv[:, 2 * D:].reshape(B, S, D)
        attn = pallas_flash_attention(q, k, v, nheads).reshape(B * S, D)
        xf = xf + pallas_matmul(attn, lp["wo"])                       # residual (bf16)
        # --- MLP block: fused LN + w1 -> gelu -> w2 ---
        xf = xf + pallas_ln_mlp(xf, lp["w1"], lp["w2"])
    return xf.reshape(B, S, D)


def diarize_gpt_forward(params, cfg, audio_latents, labels, audio_lengths, label_lengths):
    """Replicates DiarizeGPT.forward (audio_encode='dac', use_time_pos=False, dropout=0.0)."""
    D = cfg["dmodel"]
    B, Ta, L = audio_latents.shape

    # audio_encode == 'dac': lengths // 320; dac.encode replaced by pre-encoded latents.
    audio_frame_lengths = [int(l) // 320 for l in audio_lengths]

    # audio_proj (Linear, zero-init bias) fused bias-add in the matmul kernel
    a2d = pallas_matmul(audio_latents.reshape(B * Ta, L), params["audio_proj_w"],
                        bias=params["audio_proj_b"], out_dtype=jnp.float32)
    audio = a2d.reshape(B, Ta, D) + scaled_sinusoidal(
        jnp.arange(Ta), D, params["audio_pos_scale"])[None]

    Tl = labels.shape[1]
    text_embs = params["text_emb"][labels] + scaled_sinusoidal(
        jnp.arange(Tl), D, params["text_pos_scale"])[None]

    # per-batch ragged concat: [audio_valid, start_diarize_emb, text_embs[:ll-1]]
    label_lens = [int(l) for l in label_lengths]
    embs = []
    for b in range(B):
        al, ll = audio_frame_lengths[b], label_lens[b]
        emb = jnp.concatenate(
            [audio[b, :al], params["start_diarize_emb"][None, :], text_embs[b, : ll - 1]],
            axis=0,
        )
        embs.append(emb)
    maxlen = max(e.shape[0] for e in embs)
    # Pad to the next multiple of 128 of the true ragged max length instead of the
    # full max_seq_len: causal attention makes the gathered positions identical,
    # and attention/matmuls stop paying O(S^2)/O(S) for dead tokens.
    S_pad = max(128, ((maxlen + 127) // 128) * 128)
    embs = jnp.stack([jnp.pad(e, ((0, S_pad - e.shape[0]), (0, 0))) for e in embs])

    x = decoder_forward(params, embs.astype(jnp.bfloat16), cfg["nheads"])   # (B, S_pad, D)

    # gather the latents that predict the label tokens; pad rows to Tl so logits rows
    # line up 1:1 with labels.reshape(-1) (fixes the maxll != Tl misalignment)
    text_latents = []
    for b in range(B):
        al, ll = audio_frame_lengths[b], label_lens[b]
        t = x[b, al: al + ll]
        text_latents.append(jnp.pad(t, ((0, Tl - ll), (0, 0))))
    text_latents = jnp.stack(text_latents)                                  # (B, Tl, D)

    # final decoder LayerNorm fused into text_head (LN is row-wise, so LN∘gather == gather∘LN)
    logits = pallas_matmul(text_latents.reshape(B * Tl, D), params["text_head_w"],
                           apply_ln=True, out_dtype=jnp.float32)
    loss = pallas_cross_entropy(logits, labels.reshape(-1))
    return loss


# -----------------------------------------------------------------------------
# Deterministic parameter init (std=0.02 normals, zero biases); matmul weights bf16
# -----------------------------------------------------------------------------
def init_params(key, D, num_embs, latent_dim, nlayers):
    std = 0.02
    ks = jax.random.split(key, 4 + 4 * nlayers)
    params = {
        "text_emb": jax.random.normal(ks[0], (num_embs, D), jnp.float32) * std,
        "text_head_w": (jax.random.normal(ks[1], (D, num_embs), jnp.float32) * std
                        ).astype(jnp.bfloat16),
        "start_diarize_emb": jax.random.normal(ks[2], (D,), jnp.float32) * std,
        "audio_proj_w": (jax.random.normal(ks[3], (latent_dim, D), jnp.float32) * std
                         ).astype(jnp.bfloat16),
        "audio_proj_b": jnp.zeros((D,), jnp.float32),
        "audio_pos_scale": jnp.float32(D ** -0.5),
        "text_pos_scale": jnp.float32(D ** -0.5),
        "layers": [],
    }
    idx = 4
    for _ in range(nlayers):
        params["layers"].append(
            {
                "wqkv": (jax.random.normal(ks[idx + 0], (D, 3 * D), jnp.float32) * std
                         ).astype(jnp.bfloat16),
                "wo": (jax.random.normal(ks[idx + 1], (D, D), jnp.float32) * std
                       ).astype(jnp.bfloat16),
                "w1": (jax.random.normal(ks[idx + 2], (D, 4 * D), jnp.float32) * std
                       ).astype(jnp.bfloat16),
                "w2": (jax.random.normal(ks[idx + 3], (4 * D, D), jnp.float32) * std
                       ).astype(jnp.bfloat16),
            }
        )
        idx += 4
    return params


# -----------------------------------------------------------------------------
if __name__ == "__main__":
    # synthetic config: dmodel=128, 4 heads, 2 layers, 32 token embeddings,
    # 4 speaker classes, DAC latent_dim=64
    cfg = dict(dmodel=128, nheads=4, layers=2, num_embs=32, num_speakers=4,
               latent_dim=64, max_secs=2.0, sample_rate=5920)

    key = jax.random.PRNGKey(0)
    kp, ka = jax.random.split(key)
    params = init_params(kp, cfg["dmodel"], cfg["num_embs"], cfg["latent_dim"], cfg["layers"])

    B, TA = 2, 16
    # pre-encoded DAC latents, layout (B, T_frames, latent_dim)
    audio_latents = jax.random.normal(ka, (B, TA, cfg["latent_dim"]), jnp.float32)
    # raw sample lengths (forward divides by 320 to get frame counts 16 and 12)
    audio_lengths = jnp.array([16 * 320, 12 * 320], dtype=jnp.int32)
    # label tokens: triplets (start_time, end_time, class) + EOS(=1), pad(=0)
    labels = jnp.array(
        [[5, 9, 29, 10, 14, 28, 15, 20, 30, 1],
         [3, 8, 31, 12, 18, 28, 1, 0, 0, 0]], dtype=jnp.int32)
    label_lengths = jnp.array([10, 7], dtype=jnp.int32)

    loss = diarize_gpt_forward(params, cfg, audio_latents, labels, audio_lengths, label_lengths)
    jax.block_until_ready(loss)
    assert loss.shape == () and jnp.isfinite(loss)
    print("KERNEL_OK")
</pallas_src>

<mosaic_0001>
module attributes {stable_mosaic.version = 11 : i64} {
  func.func @_matmul_kernel(%arg0: i32, %arg1: i32, %arg2: i32, %arg3: memref<32x64xbf16, #tpu.memory_space<vmem>>, %arg4: memref<64x128xbf16, #tpu.memory_space<vmem>>, %arg5: memref<1x128xf32, #tpu.memory_space<vmem>>, %arg6: memref<32x128xf32, #tpu.memory_space<vmem>>, %arg7: memref<32x128xf32, #tpu.memory_space<vmem>>) attributes {dimension_semantics = [#tpu.dimension_semantics<parallel>, #tpu.dimension_semantics<parallel>, #tpu.dimension_semantics<arbitrary>], iteration_bounds = array<i64: 1, 1, 1>, scalar_prefetch = 0 : i64, scratch_operands = 1 : i64, tpu.core_type = #tpu.core_type<tc>, window_params = [{transform_indices = @transform_0, window_bounds = array<i64: 32, 64>}, {transform_indices = @transform_1, window_bounds = array<i64: 64, 128>}, {transform_indices = @transform_2, window_bounds = array<i64: 1, 128>}, {transform_indices = @transform_3, window_bounds = array<i64: 32, 128>}]} {
    %c0_i32 = arith.constant 0 : i32
    %0 = arith.cmpi eq, %arg2, %c0_i32 : i32
    %1 = arith.extui %0 : i1 to i32
    %c0_i32_0 = arith.constant 0 : i32
    %2 = arith.cmpi ne, %1, %c0_i32_0 : i32
    scf.if %2 {
      %cst_10 = arith.constant 0.000000e+00 : f32
      %12 = vector.broadcast %cst_10 : f32 to vector<32x128xf32>
      %c0_11 = arith.constant 0 : index
      %c0_12 = arith.constant 0 : index
      %13 = vector.load %arg7[%c0_11, %c0_12] : memref<32x128xf32, #tpu.memory_space<vmem>>, vector<32x128xf32>
      tpu.vector_store %arg7[%c0_11, %c0_12], %12 {strides = array<i32>} : memref<32x128xf32, #tpu.memory_space<vmem>>, vector<32x128xf32>,
    } else {
    }
    %c0 = arith.constant 0 : index
    %c0_1 = arith.constant 0 : index
    %3 = vector.load %arg3[%c0, %c0_1] : memref<32x64xbf16, #tpu.memory_space<vmem>>, vector<32x64xbf16>
    %c0_2 = arith.constant 0 : index
    %c0_3 = arith.constant 0 : index
    %4 = vector.load %arg7[%c0_2, %c0_3] : memref<32x128xf32, #tpu.memory_space<vmem>>, vector<32x128xf32>
    %c0_4 = arith.constant 0 : index
    %c0_5 = arith.constant 0 : index
    %5 = vector.load %arg4[%c0_4, %c0_5] : memref<64x128xbf16, #tpu.memory_space<vmem>>, vector<64x128xbf16>
    %cst = arith.constant dense<0.000000e+00> : vector<32x128xf32>
    %6 = tpu.matmul %3, %5, %cst {dimension_numbers = #tpu.dot_dimension_numbers<[1], [0], [0], [1], [0, 0, 1, 1], [], []>} : vector<32x64xbf16>, vector<64x128xbf16>, vector<32x128xf32> -> vector<32x128xf32>
    %7 = arith.addf %4, %6 : vector<32x128xf32>
    %c0_6 = arith.constant 0 : index
    %c0_7 = arith.constant 0 : index
    %8 = vector.load %arg7[%c0_6, %c0_7] : memref<32x128xf32, #tpu.memory_space<vmem>>, vector<32x128xf32>
    tpu.vector_store %arg7[%c0_6, %c0_7], %7 {strides = array<i32>} : memref<32x128xf32, #tpu.memory_space<vmem>>, vector<32x128xf32>,
    %c0_i32_8 = arith.constant 0 : i32
    %9 = arith.cmpi eq, %arg2, %c0_i32_8 : i32
    %10 = arith.extui %9 : i1 to i32
    %c0_i32_9 = arith.constant 0 : i32
    %11 = arith.cmpi ne, %10, %c0_i32_9 : i32
    scf.if %11 {
      %c0_10 = arith.constant 0 : index
      %c0_11 = arith.constant 0 : index
      %12 = vector.load %arg7[%c0_10, %c0_11] : memref<32x128xf32, #tpu.memory_space<vmem>>, vector<32x128xf32>
      %c0_12 = arith.constant 0 : index
      %c0_13 = arith.constant 0 : index
      %13 = vector.load %arg5[%c0_12, %c0_13] : memref<1x128xf32, #tpu.memory_space<vmem>>, vector<1x128xf32>
      %14 = vector.broadcast %13 : vector<1x128xf32> to vector<32x128xf32>
      %15 = arith.addf %12, %14 : vector<32x128xf32>
      %c0_14 = arith.constant 0 : index
      %c0_15 = arith.constant 0 : index
      %16 = vector.load %arg6[%c0_14, %c0_15] : memref<32x128xf32, #tpu.memory_space<vmem>>, vector<32x128xf32>
      tpu.vector_store %arg6[%c0_14, %c0_15], %15 {strides = array<i32>} : memref<32x128xf32, #tpu.memory_space<vmem>>, vector<32x128xf32>,
    } else {
    }
    return
  }
  func.func @transform_0(%arg0: i32, %arg1: i32, %arg2: i32) -> (i32, i32) {
    %c0_i32 = arith.constant 0 : i32
    return %arg0, %arg2 : i32, i32
  }
  func.func @transform_1(%arg0: i32, %arg1: i32, %arg2: i32) -> (i32, i32) {
    %c0_i32 = arith.constant 0 : i32
    return %arg2, %arg1 : i32, i32
  }
  func.func @transform_2(%arg0: i32, %arg1: i32, %arg2: i32) -> (i32, i32) {
    %c0_i32 = arith.constant 0 : i32
    %c0_i32_0 = arith.constant 0 : i32
    return %c0_i32, %arg1 : i32, i32
  }
  func.func @transform_3(%arg0: i32, %arg1: i32, %arg2: i32) -> (i32, i32) {
    %c0_i32 = arith.constant 0 : i32
    return %arg0, %arg1 : i32, i32
  }
}

</mosaic_0001>

<bundles_post_ra>
// kernel: tpu_custom_call.1
= control target key start
LH: loop header
LB: loop body
LE: loop exit
PB: predicated region body
PF: predicated region fallthrough
CT: control target
= control target key end

     0   :  { %8 = vsyncpa [#allocation4], 0  ;;  %s384_s0 = inlined_call_operand.hbm [shape: bf16[32,64], index: 0, kind: input, shape index: {}]   ;;  %s385_s1 = inlined_call_operand.hbm [shape: bf16[64,128], index: 1, kind: input, shape index: {}]   ;;  %s386_s2 = inlined_call_operand.vmem [shape: f32[1,128], index: 2, kind: input, shape index: {}]   ;;  %s387_s3 = inlined_call_operand.hbm [shape: f32[32,128], index: 3, kind: output, shape index: {}]  }
   0x1   :  { %9 = vsyncpa [#allocation7], 0 }
   0x2   :  { %10 = vsyncpa [#allocation5], 0  ;;  %s318_s12 = smov [#allocation3]   ;;  %s246_s16 = scalar_lea.hbm %s384_s0, 256 }
   0x3   :  { %s16_s13 = sshll.u32 %s318_s12, 4  ;;  %p247_p0 = scmp.ne.s32.totalorder %s384_s0, %s246_s16  ;;  %s17_s13 = int_to_ptr.vmem [resolvable:$true] %s16_s13 }
   0x4   :  { %p250_p1 = scmp.lt.u32.totalorder %s246_s16, %s384_s0 }
   0x6   :  { %p252_p2 = pnand %p250_p1, %p247_p0 }
   0x8   :  { %255 = shalt.err (!%p252_p2)
}
   0x9   :  { %s256_s21 = scalar_lea.vmem %s17_s13, 256  ;;  %p261_p4 = scmp.lt.s32.totalorder %s17_s13, %s17_s13 }
   0xa   :  { %p257_p3 = scmp.ne.s32.totalorder %s17_s13, %s256_s21  ;;  %p262_p5 = scmp.lt.s32.totalorder %s256_s21, %s256_s21 }
   0xc   :  { %p263_p6 = por %p262_p5, %p261_p4 }
   0xe   :  { %p264_p7 = pnand %p263_p6, %p257_p3 }
  0x10   :  { %267 = shalt.err (!%p264_p7)
}
  0x11   :  { %s319_s22 = smov 64   ;;  %s320_s23 = smov 4  }
  0x12   :  { %22 = dma.hbm_to_vmem [thread:$0]  %s384_s0, 256, %s17_s13, [#allocation4], %s319_s22, %s319_s22, %s320_s23  }
  0x13   :  { %s321_s26 = smov [#allocation6]   ;;  %s268_s30 = scalar_lea.hbm %s385_s1, 512 }
  0x14   :  { %s28_s27 = sshll.u32 %s321_s26, 4  ;;  %p269_p8 = scmp.ne.s32.totalorder %s385_s1, %s268_s30  ;;  %s29_s27 = int_to_ptr.vmem [resolvable:$true] %s28_s27 }
  0x15   :  { %p272_p9 = scmp.lt.u32.totalorder %s268_s30, %s385_s1 }
  0x17   :  { %p274_p10 = pnand %p272_p9, %p269_p8 }
  0x19   :  { %277 = shalt.err (!%p274_p10)
}
  0x1a   :  { %s278_s8 = scalar_lea.vmem %s29_s27, 512  ;;  %p283_p12 = scmp.lt.s32.totalorder %s29_s27, %s29_s27 }
  0x1b   :  { %p279_p11 = scmp.ne.s32.totalorder %s29_s27, %s278_s8  ;;  %p284_p13 = scmp.lt.s32.totalorder %s278_s8, %s278_s8 }
  0x1d   :  { %p285_p0 = por %p284_p13, %p283_p12 }
  0x1f   :  { %p286_p1 = pnand %p285_p0, %p279_p11 }
  0x21   :  { %289 = shalt.err (!%p286_p1)
}
  0x22   :  { %34 = dma.hbm_to_vmem [thread:$0]  %s385_s1, 512, %s29_s27, [#allocation7], %s319_s22, %s319_s22, %s320_s23  }
  0x23   :  { %312 = dma.done.wait [#allocation4], 256  }
  0x24   :  { %313 = vsyncadd [#allocation4], 4294967040 }
  0x25   :  { %314 = dma.done.wait [#allocation7], 512  }
  0x26   :  { %315 = vsyncadd [#allocation7], 4294966784  ;;  %v240_v0 = vld [vmem:[#allocation6] sm:$0xff]   ;;  %v241_v1 = vld [vmem:[#allocation6 + $0x8] sm:$0xff]   ;;  %vm102_vm0 = vcmask 523264   ;;  %s322_s11 = smov [#allocation8]  }
  0x27   :  { %221 = vmatprep.subr.bf16.mxu0 %v240_v0  ;;  %v242_v2 = vld [vmem:[#allocation6 + $0x10] sm:$0xff]   ;;  %v243_v4 = vld [vmem:[#allocation6 + $0x18] sm:$0xff]   ;;  %s193_s12 = sshll.u32 %s322_s11, 4  ;;  %s194_s12 = int_to_ptr.vmem [resolvable:$true] %s193_s12 }
  0x28   :  { %222 = vmatpush3.bf16.msra.mxu0 %v240_v0  ;;  %v244_v3 = vld [vmem:[#allocation3] sm:$0xff]   ;;  %v245_v5 = vld [vmem:[#allocation3 + $0x8] sm:$0xff]   ;;  %s290_s13 = scalar_lea.vmem %s194_s12, 512  ;;  %p295_p3 = scmp.lt.s32.totalorder %s194_s12, %s194_s12 }
  0x29   :  { %223 = vmatprep.subr.bf16.mxu0 %v241_v1  ;;  %229 = vmatprep.mubr.msk.bf16.mxu0 %vm102_vm0, %v244_v3  ;;  %v214_v6 = vld [vmem:[%s386_s2] ss:$0 sm:$0xff]  ;;  %p291_p2 = scmp.ne.s32.totalorder %s194_s12, %s290_s13  ;;  %p296_p4 = scmp.lt.s32.totalorder %s290_s13, %s290_s13 }
  0x2b   :  { %p297_p5 = por %p296_p4, %p295_p3 }
  0x2c   :  { %224 = vmatpush3.bf16.msra.mxu0 %v241_v1 }
  0x2d   :  { %225 = vmatprep.subr.bf16.mxu0 %v242_v2  ;;  %p298_p6 = pnand %p297_p5, %p291_p2 }
  0x30   :  { %226 = vmatpush3.bf16.msra.mxu0 %v242_v2 }
  0x31   :  { %227 = vmatprep.subr.bf16.mxu0 %v243_v4 }
  0x34   :  { %228 = vmatpush3.bf16.msra.mxu0 %v243_v4 }
  0x37   :  { %230 = vmatmul.mubr.msk.bf16.vlgmr.msra.gmra.mrb[0].mxu0 %vm102_vm0, %v245_v5 }
 0x10a   :  { %v231_v7 = vpop.f32.mrb[0].mxu0 }
 0x10b   :  { %v182_v8 = vadd.f32 %v231_v7, %v214_v6  ;;  %v143_v9 = vpop.f32.mrb[1].mxu0 }
 0x10c   :  { %v180_v10 = vadd.f32 %v214_v6, %v143_v9  ;;  %v232_v11 = vpop.f32.mrb[2].mxu0 }
 0x10d   :  { %186 = vst [vmem:[#allocation8 + $0x10] sm:$0xff] %v182_v8  ;;  %v183_v12 = vadd.f32 %v232_v11, %v214_v6  ;;  %v146_v13 = vpop.f32.mrb[3].mxu0 }
 0x10e   :  { %184 = vst [vmem:[#allocation8] sm:$0xff] %v180_v10  ;;  %v181_v14 = vadd.f32 %v214_v6, %v146_v13 }
 0x10f   :  { %187 = vst [vmem:[#allocation8 + $0x18] sm:$0xff] %v183_v12 }
 0x110   :  { %185 = vst [vmem:[#allocation8 + $0x8] sm:$0xff] %v181_v14 }
 0x111   :  { %301 = shalt.err (!%p298_p6)
}
 0x112   :  { %s302_s15 = scalar_lea.hbm %s387_s3, 512 }
 0x113   :  { %p303_p7 = scmp.ne.s32.totalorder %s387_s3, %s302_s15  ;;  %p306_p8 = scmp.lt.u32.totalorder %s302_s15, %s387_s3 }
 0x115   :  { %p308_p9 = pnand %p306_p8, %p303_p7 }
 0x117   :  { %311 = shalt.err (!%p308_p9)
}
 0x118   :  { %s323_s20 = smov 128   ;;  %s324_s21 = smov 8  }
 0x119   :  { %199 = dma.vmem_to_hbm [thread:$0]  %s194_s12, 512, %s387_s3, [#allocation5], %s323_s20, %s323_s20, %s324_s21  }
 0x11a   :  { %316 = dma.done.wait [#allocation5], 512  }
 0x11b   :  { %317 = vsyncadd [#allocation5], 4294966784 }
 0x11c   :  { %203 = vsyncpa [#allocation4], 1 }
 0x11d   :  { %204 = vsyncpa [#allocation7], 1 }
 0x11e   :  { %205 = vsyncpa [#allocation5], 1 }

</bundles_post_ra>
